<compile_context>
chip_gen: v7x
topology: tpu7x:2x2x1
jax: 0.10.0
libtpu: 0.0.40
codegen_flags: <defaults>
</compile_context>

<pallas_src>
import jax
import jax.numpy as jnp
from jax.experimental import pallas as pl
from jax.experimental.pallas import tpu as pltpu

IN_FEATURES = 2
OUT_FEATURES = 1
LANE = 128          # batch elements per lane-dense row
BLOCK_ROWS = 1024   # rows of 128 batch elems per grid step:
                    #   x block  (2, 1024, 128) f32 = 1 MiB
                    #   out block   (1024, 128) f32 = 512 KiB
                    # -> ~3 MiB double-buffered, fits every generation's VMEM.


def xor_linear_kernel(params_ref, x_ref, o_ref):
    # params_ref: SMEM (3,) f32 = [w0, w1, b]
    # x_ref:      VMEM (2, br, 128) f32  -- feature planes, batch on (sublane, lane)
    # o_ref:      VMEM (br, 128) f32     -- lane-dense output slab
    w0 = params_ref[0]
    w1 = params_ref[1]
    b = params_ref[2]
    # Pure VPU FMA; scalars from SMEM are broadcast as immediates.
    o_ref[...] = x_ref[0] * w0 + x_ref[1] * w1 + b


def xor_linear(x, weight, bias):
    """x: (B, 2) f32, weight: (1, 2) f32 (PyTorch layout), bias: (1,) f32 -> (B, 1) f32."""
    B = x.shape[0]
    R = (B + LANE - 1) // LANE            # number of lane-dense batch rows
    Bp = R * LANE
    br = min(BLOCK_ROWS, R)               # rows per grid step (== R for small B)
    grid = (pl.cdiv(R, br),)

    # Deinterleave the two input features (one small transpose) and view the
    # batch axis as (R, 128) lanes. This is the only wrapper-side copy and it
    # moves ~2x the real input bytes (vs. 64x with the old 128-lane padding).
    x_planes = jnp.pad(
        x.T.astype(jnp.float32), ((0, 0), (0, Bp - B))
    ).reshape(IN_FEATURES, R, LANE)

    # Fold weight + bias into a single scalar table for SMEM: [w0, w1, b].
    params = jnp.concatenate(
        [weight.reshape(-1), bias.reshape(-1)]).astype(jnp.float32)

    out_rows = pl.pallas_call(
        xor_linear_kernel,
        out_shape=jax.ShapeDtypeStruct((R, LANE), jnp.float32),
        grid_spec=pltpu.PrefetchScalarGridSpec(
            num_scalar_prefetch=0,
            grid=grid,
            in_specs=[
                # weight/bias scalars live in SMEM, whole array, no blocking.
                pl.BlockSpec(memory_space=pltpu.MemorySpace.SMEM),
                # batch-tiled, lane-dense feature planes.
                pl.BlockSpec((IN_FEATURES, br, LANE), lambda i: (0, i, 0)),
            ],
            out_specs=pl.BlockSpec((br, LANE), lambda i: (i, 0)),
        ),
        compiler_params=pltpu.CompilerParams(
            # Batch tiles are independent -> let v7x shard them across its 2 TCs.
            dimension_semantics=("parallel",),
        ),
    )(params, x_planes)

    # Back to the PyTorch-facing (B, 1) shape (moves only B*4 bytes).
    return out_rows.reshape(Bp)[:B].reshape(B, OUT_FEATURES)


if __name__ == "__main__":
    key = jax.random.PRNGKey(0)
    k_w, k_b, k_x = jax.random.split(key, 3)

    # Deterministic parameter init mirroring nn.Linear's U(-1/sqrt(fan_in), 1/sqrt(fan_in)).
    bound = 1.0 / jnp.sqrt(float(IN_FEATURES))
    weight = jax.random.uniform(k_w, (OUT_FEATURES, IN_FEATURES), jnp.float32, -bound, bound)
    bias = jax.random.uniform(k_b, (OUT_FEATURES,), jnp.float32, -bound, bound)

    # XOR truth-table rows plus a few random rows: batch = 8.
    xor_rows = jnp.array([[0.0, 0.0], [0.0, 1.0], [1.0, 0.0], [1.0, 1.0]], jnp.float32)
    rand_rows = jax.random.normal(k_x, (4, IN_FEATURES), jnp.float32)
    x = jnp.concatenate([xor_rows, rand_rows], axis=0)  # (8, 2)

    out = xor_linear(x, weight, bias)
    jax.block_until_ready(out)

    # Reference: plain JAX linear (matches torch's x @ W.T + b).
    ref = x @ weight.T + bias
    assert out.shape == (x.shape[0], OUT_FEATURES)
    assert jnp.allclose(out, ref, atol=1e-5, rtol=1e-5)

    print("KERNEL_OK")
</pallas_src>

<mosaic_0001>
module attributes {stable_mosaic.version = 11 : i64} {
  func.func @xor_linear_kernel(%arg0: i32, %arg1: memref<3xf32, #tpu.memory_space<smem>>, %arg2: memref<2x1x128xf32, #tpu.memory_space<vmem>>, %arg3: memref<1x128xf32, #tpu.memory_space<vmem>>) attributes {dimension_semantics = [#tpu.dimension_semantics<parallel>], iteration_bounds = array<i64: 1>, scalar_prefetch = 0 : i64, scratch_operands = 0 : i64, tpu.core_type = #tpu.core_type<tc>, window_params = [{transform_indices = @transform_0, window_bounds = array<i64: 3>}, {transform_indices = @transform_1, window_bounds = array<i64: 2, 1, 128>}, {transform_indices = @transform_2, window_bounds = array<i64: 1, 128>}]} {
    %c0 = arith.constant 0 : index
    %0 = memref.load %arg1[%c0] : memref<3xf32, #tpu.memory_space<smem>>
    %c1 = arith.constant 1 : index
    %1 = memref.load %arg1[%c1] : memref<3xf32, #tpu.memory_space<smem>>
    %c2 = arith.constant 2 : index
    %2 = memref.load %arg1[%c2] : memref<3xf32, #tpu.memory_space<smem>>
    %c0_0 = arith.constant 0 : index
    %c0_1 = arith.constant 0 : index
    %c0_2 = arith.constant 0 : index
    %3 = vector.load %arg2[%c0_0, %c0_1, %c0_2] : memref<2x1x128xf32, #tpu.memory_space<vmem>>, vector<1x1x128xf32>
    %4 = vector.shape_cast %3 : vector<1x1x128xf32> to vector<1x128xf32>
    %5 = vector.broadcast %0 : f32 to vector<1x128xf32>
    %6 = arith.mulf %4, %5 : vector<1x128xf32>
    %c1_3 = arith.constant 1 : index
    %c0_4 = arith.constant 0 : index
    %c0_5 = arith.constant 0 : index
    %7 = vector.load %arg2[%c1_3, %c0_4, %c0_5] : memref<2x1x128xf32, #tpu.memory_space<vmem>>, vector<1x1x128xf32>
    %8 = vector.shape_cast %7 : vector<1x1x128xf32> to vector<1x128xf32>
    %9 = vector.broadcast %1 : f32 to vector<1x128xf32>
    %10 = arith.mulf %8, %9 : vector<1x128xf32>
    %11 = arith.addf %6, %10 : vector<1x128xf32>
    %12 = vector.broadcast %2 : f32 to vector<1x128xf32>
    %13 = arith.addf %11, %12 : vector<1x128xf32>
    %c0_6 = arith.constant 0 : index
    %c0_7 = arith.constant 0 : index
    %14 = vector.load %arg3[%c0_6, %c0_7] : memref<1x128xf32, #tpu.memory_space<vmem>>, vector<1x128xf32>
    tpu.vector_store %arg3[%c0_6, %c0_7], %13 {strides = array<i32>} : memref<1x128xf32, #tpu.memory_space<vmem>>, vector<1x128xf32>,
    return
  }
  func.func @transform_0(%arg0: i32) -> i32 {
    %c0_i32 = arith.constant 0 : i32
    %c0_i32_0 = arith.constant 0 : i32
    return %c0_i32 : i32
  }
  func.func @transform_1(%arg0: i32) -> (i32, i32, i32) {
    %c0_i32 = arith.constant 0 : i32
    %c0_i32_0 = arith.constant 0 : i32
    %c0_i32_1 = arith.constant 0 : i32
    return %c0_i32, %arg0, %c0_i32_0 : i32, i32, i32
  }
  func.func @transform_2(%arg0: i32) -> (i32, i32) {
    %c0_i32 = arith.constant 0 : i32
    %c0_i32_0 = arith.constant 0 : i32
    return %arg0, %c0_i32 : i32, i32
  }
}

</mosaic_0001>

<bundles_post_ra>
// kernel: tpu_custom_call.1
= control target key start
LH: loop header
LB: loop body
LE: loop exit
PB: predicated region body
PF: predicated region fallthrough
CT: control target
= control target key end

     0   :  { %7 = vsyncpa [#allocation4], 0  ;;  %s140_s0 = inlined_call_operand.hbm [shape: f32[3], index: 0, kind: input, shape index: {}]   ;;  %s141_s1 = inlined_call_operand.vmem [shape: f32[2,1,128], index: 1, kind: input, shape index: {}]   ;;  %s142_s2 = inlined_call_operand.hbm [shape: f32[1,128], index: 2, kind: output, shape index: {}]  }
   0x1   :  { %8 = vsyncpa [#allocation3], 0  ;;  %s57_s11 = scalar_lea.hbm %s140_s0, 16 }
   0x2   :  { %p58_p0 = scmp.ne.s32.totalorder %s140_s0, %s57_s11  ;;  %p61_p1 = scmp.lt.u32.totalorder %s57_s11, %s140_s0 }
   0x4   :  { %p63_p2 = pnand %p61_p1, %p58_p0 }
   0x6   :  { %66 = shalt.err (!%p63_p2)
}
   0x7   :  { %s93_s16 = smov [#allocation2]  }
   0x8   :  { %16 = dma.hbm_to_smem %s140_s0, 16, %s93_s16, [#allocation4]  }
   0x9   :  { %89 = dma.done.wait [#allocation4], 16  }
   0xa   :  { %90 = vsyncadd [#allocation4], 4294967280 }
   0xb   :  { %22 = sfence }
   0xc   :  { %s23_s19 = sld [smem:[#allocation2]]  ;;  %s52_s20 = sld [smem:[#allocation2 + $0x1]]  ;;  %v26_v0 = vld [vmem:[%s141_s1] sm:$0x1]  ;;  %v54_v1 = vld [vmem:[%s141_s1 + $0x1] sm:$0x1] }
   0xd   :  { %s53_s21 = sld [smem:[#allocation2 + $0x2]]  ;;  %s94_s0 = smov [#allocation5]  }
   0xe   :  { %s43_s26 = sshll.u32 %s94_s0, 4  ;;  %s44_s26 = int_to_ptr.vmem [resolvable:$true] %s43_s26 }
   0xf   :  { %s67_s27 = scalar_lea.vmem %s44_s26, 16  ;;  %s71_s28 = scalar_lea.vmem %s44_s26, 32 }
  0x10   :  { %p68_p3 = scmp.ne.s32.totalorder %s44_s26, %s67_s27  ;;  %p72_p4 = scmp.lt.s32.totalorder %s44_s26, %s44_s26 }
  0x11   :  { %p73_p5 = scmp.lt.s32.totalorder %s71_s28, %s67_s27 }
  0x12   :  { %v27_v2 = vstv %s23_s19  ;;  %v31_v3 = vstv %s52_s20 }
  0x13   :  { %v28_v4 = vmul.f32 %v27_v2, %v26_v0  ;;  %v32_v5 = vmul.f32 %v54_v1, %v31_v3  ;;  %v34_v6 = vstv %s53_s21  ;;  %p74_p6 = por %p73_p5, %p72_p4 }
  0x15   :  { %v33_v7 = vadd.f32 %v32_v5, %v28_v4  ;;  %p75_p7 = pnand %p74_p6, %p68_p3 }
  0x17   :  { %v35_v8 = vadd.f32 %v34_v6, %v33_v7 }
  0x19   :  { %36 = vst [vmem:[#allocation5] sm:$0x1] %v35_v8 }
  0x1a   :  { %78 = shalt.err (!%p75_p7)
}
  0x1b   :  { %s79_s30 = scalar_lea.hbm %s142_s2, 16 }
  0x1c   :  { %p80_p8 = scmp.ne.s32.totalorder %s142_s2, %s79_s30  ;;  %p83_p9 = scmp.lt.u32.totalorder %s79_s30, %s142_s2 }
  0x1e   :  { %p85_p10 = pnand %p83_p9, %p80_p8 }
  0x20   :  { %88 = shalt.err (!%p85_p10)
}
  0x21   :  { %46 = dma.vmem_to_hbm [thread:$0]  %s44_s26, 16, %s142_s2, [#allocation3]  }
  0x22   :  { %91 = dma.done.wait [#allocation3], 16  }
  0x23   :  { %92 = vsyncadd [#allocation3], 4294967280 }
  0x24   :  { %50 = vsyncpa [#allocation3], 1 }
  0x25   :  { %51 = vsyncpa [#allocation4], 1 }

</bundles_post_ra>
